<compile_context>
chip_gen: v7x
topology: tpu7x:2x2x1
jax: 0.10.0
libtpu: 0.0.40
codegen_flags: <defaults>
</compile_context>

<pallas_src>
import functools
import math

import jax
import jax.numpy as jnp
from jax.experimental import pallas as pl
from jax.experimental.pallas import tpu as pltpu


# ----------------------------------------------------------------------------- #
# Generation-aware scoped-VMEM limit
# ----------------------------------------------------------------------------- #
def _vmem_limit_bytes():
    cap = 128 * 1024 * 1024
    try:
        info = pltpu.get_tpu_info()
        cap = int(getattr(info, "vmem_capacity_bytes", cap) or cap)
    except Exception:
        pass
    # ~25% headroom for double-buffered BlockSpecs + compiler-internal scratch:
    # 128 MiB physical (v5e/v6e) -> 96 MiB, 64 MiB physical (v7x) -> 48 MiB.
    return min(int(cap * 3 // 4), 100 * 1024 * 1024)


VMEM_LIMIT = _vmem_limit_bytes()


# ----------------------------------------------------------------------------- #
# Tiling helper
# ----------------------------------------------------------------------------- #
def _choose_tile(dim, target, aligns=(128,)):
    """Largest divisor of `dim` <= target that is a multiple of one of `aligns`
    (tried in priority order). Falls back to the full extent (always layout-legal)."""
    if dim <= target:
        return dim
    for align in aligns:
        best = 0
        t = align
        while t <= target:
            if dim % t == 0:
                best = t
            t += align
        if best:
            return best
    return dim


# ----------------------------------------------------------------------------- #
# Pallas kernels
# ----------------------------------------------------------------------------- #
def matmul_bias_kernel(x_ref, w_ref, b_ref, o_ref, acc_ref):
    # x: [tm, tk] bf16, w: [tk, tn] bf16, b: [1, tn] f32  ->  o: [tm, tn] (bf16 or f32)
    @pl.when(pl.program_id(2) == 0)
    def _():
        acc_ref[...] = jnp.zeros_like(acc_ref)

    acc_ref[...] += jnp.dot(x_ref[...], w_ref[...], preferred_element_type=jnp.float32)

    @pl.when(pl.program_id(2) == pl.num_programs(2) - 1)
    def _():
        o_ref[...] = (acc_ref[...] + b_ref[...]).astype(o_ref.dtype)


def ffn_kernel(x_ref, w1_ref, b1_ref, w2_ref, b2_ref, o_ref, acc_ref):
    # F-tiled Linear -> ReLU -> Linear.  Grid = (M tiles, F tiles); the second matmul
    # accumulates into an f32 [tm, D] scratch so the working set is bounded in F.
    @pl.when(pl.program_id(1) == 0)
    def _():
        acc_ref[...] = jnp.zeros_like(acc_ref)

    h = jnp.dot(x_ref[...], w1_ref[...], preferred_element_type=jnp.float32) + b1_ref[...]
    h = jnp.maximum(h, 0.0)
    acc_ref[...] += jnp.dot(h.astype(jnp.bfloat16), w2_ref[...],
                            preferred_element_type=jnp.float32)

    @pl.when(pl.program_id(1) == pl.num_programs(1) - 1)
    def _():
        o_ref[...] = (acc_ref[...] + b2_ref[...]).astype(o_ref.dtype)


def add_layernorm_kernel(x_ref, r_ref, g_ref, b_ref, o_ref, *, eps):
    # fused residual add + LayerNorm (f32 statistics), row-tiled over M, bf16 in/out
    x = x_ref[...].astype(jnp.float32) + r_ref[...].astype(jnp.float32)
    mu = jnp.mean(x, axis=-1, keepdims=True)
    var = jnp.mean((x - mu) * (x - mu), axis=-1, keepdims=True)
    o_ref[...] = ((x - mu) * jax.lax.rsqrt(var + eps) * g_ref[...] + b_ref[...]
                  ).astype(o_ref.dtype)


def mha_kernel(q_ref, k_ref, v_ref, m_ref, o_ref, *rest, n_head, causal, block_q):
    # q: [1, tq, D] bf16 (Q already scaled by 1/sqrt(Dh) via folded weights)
    # k/v: [1, Lk, D] bf16, m: [1, 1, Lk] f32 additive key-padding mask
    a_ref = rest[0] if rest else None
    q = q_ref[0]
    k = k_ref[0]
    v = v_ref[0]
    tq, D = q.shape
    lk = k.shape[0]
    dh = D // n_head

    # Head-batched views [H, L, Dh] built from static lane slices (no in-kernel transpose).
    q3 = jnp.stack([q[:, h * dh:(h + 1) * dh] for h in range(n_head)], axis=0)
    k3 = jnp.stack([k[:, h * dh:(h + 1) * dh] for h in range(n_head)], axis=0)
    v3 = jnp.stack([v[:, h * dh:(h + 1) * dh] for h in range(n_head)], axis=0)

    s = jnp.einsum("hqd,hkd->hqk", q3, k3, preferred_element_type=jnp.float32)
    s = s + m_ref[...]                               # [1,1,Lk] broadcast over heads / rows
    if causal:                                       # causal term generated in-kernel
        q_off = pl.program_id(1) * block_q
        rows = jax.lax.broadcasted_iota(jnp.int32, (1, tq, lk), 1) + q_off
        cols = jax.lax.broadcasted_iota(jnp.int32, (1, tq, lk), 2)
        s = jnp.where(cols > rows, -1e9, s)

    # f32 softmax (v5e has no bf16 VPU/EUP datapath)
    s = s - jnp.max(s, axis=-1, keepdims=True)
    p = jnp.exp(s)
    denom = jnp.sum(p, axis=-1, keepdims=True)
    if a_ref is not None:
        p = p / denom                                # exact normalization for returned map
        a_ref[0] = p
    else:
        p = p * pl.reciprocal(denom, approx=True)    # EUP slot on the fast path

    o3 = jnp.einsum("hqk,hkd->hqd", p.astype(jnp.bfloat16), v3,
                    preferred_element_type=jnp.float32)          # [H, tq, Dh]
    # Merge heads and do ONE lane-dense store of the full [tq, D] block.
    o_ref[0] = jnp.concatenate([o3[h] for h in range(n_head)], axis=-1).astype(o_ref.dtype)


# ----------------------------------------------------------------------------- #
# Pallas wrappers
# ----------------------------------------------------------------------------- #
def pallas_linear(x2d, w, b, *, out_dtype=jnp.bfloat16,
                  tm_target=256, tn_target=512, tk_target=512):
    M, K = x2d.shape
    N = w.shape[1]
    tm = _choose_tile(M, tm_target, (16, 8))          # 16-row align for bf16 sublane packing
    tn = _choose_tile(N, tn_target, (256, 128))       # prefer 256-wide MXU tiles
    tk = _choose_tile(K, tk_target, (256, 128))
    return pl.pallas_call(
        matmul_bias_kernel,
        grid=(M // tm, N // tn, K // tk),
        in_specs=[
            pl.BlockSpec((tm, tk), lambda i, j, k: (i, k)),
            pl.BlockSpec((tk, tn), lambda i, j, k: (k, j)),
            pl.BlockSpec((1, tn), lambda i, j, k: (0, j)),
        ],
        out_specs=pl.BlockSpec((tm, tn), lambda i, j, k: (i, j)),
        out_shape=jax.ShapeDtypeStruct((M, N), out_dtype),
        scratch_shapes=[pltpu.VMEM((tm, tn), jnp.float32)],
        compiler_params=pltpu.CompilerParams(
            dimension_semantics=("parallel", "parallel", "arbitrary"),
            vmem_limit_bytes=VMEM_LIMIT),
    )(x2d.astype(jnp.bfloat16), w, b)


def pallas_ffn(x2d, w1, b1, w2, b2, *, tm_target=256, tf_target=512):
    M, D = x2d.shape
    F = w1.shape[1]
    tm = _choose_tile(M, tm_target, (16, 8))
    tf = _choose_tile(F, tf_target, (256, 128))
    return pl.pallas_call(
        ffn_kernel,
        grid=(M // tm, F // tf),
        in_specs=[
            pl.BlockSpec((tm, D), lambda i, f: (i, 0)),
            pl.BlockSpec((D, tf), lambda i, f: (0, f)),
            pl.BlockSpec((1, tf), lambda i, f: (0, f)),
            pl.BlockSpec((tf, D), lambda i, f: (f, 0)),
            pl.BlockSpec((1, D), lambda i, f: (0, 0)),
        ],
        out_specs=pl.BlockSpec((tm, D), lambda i, f: (i, 0)),
        out_shape=jax.ShapeDtypeStruct((M, D), jnp.bfloat16),
        scratch_shapes=[pltpu.VMEM((tm, D), jnp.float32)],
        compiler_params=pltpu.CompilerParams(
            dimension_semantics=("parallel", "arbitrary"),
            vmem_limit_bytes=VMEM_LIMIT),
    )(x2d.astype(jnp.bfloat16), w1, b1, w2, b2)


def pallas_add_layernorm(x2d, r2d, gamma, beta, *, eps=1e-5, tm_target=512):
    M, D = x2d.shape
    tm = _choose_tile(M, tm_target, (16, 8))
    return pl.pallas_call(
        functools.partial(add_layernorm_kernel, eps=eps),
        grid=(M // tm,),
        in_specs=[
            pl.BlockSpec((tm, D), lambda i: (i, 0)),
            pl.BlockSpec((tm, D), lambda i: (i, 0)),
            pl.BlockSpec((1, D), lambda i: (0, 0)),
            pl.BlockSpec((1, D), lambda i: (0, 0)),
        ],
        out_specs=pl.BlockSpec((tm, D), lambda i: (i, 0)),
        out_shape=jax.ShapeDtypeStruct((M, D), jnp.bfloat16),
        compiler_params=pltpu.CompilerParams(
            dimension_semantics=("parallel",),
            vmem_limit_bytes=VMEM_LIMIT),
    )(x2d, r2d, gamma, beta)


def pallas_mha(q_arr, kv_arr, q_col, k_col, v_col, add_mask, n_head, d_model,
               causal=False, return_attn=False, tq_target=512):
    """q_arr: [B, Lq, nq*D] packed, kv_arr: [B, Lk, nk*D] packed.
    q/k/v are selected as D-wide column blocks (q_col/k_col/v_col) of the packed arrays,
    so the Q/KV projection outputs are never sliced/copied in HBM.
    add_mask: [B, 1, Lk] additive f32 key-padding mask."""
    assert d_model % 128 == 0, "d_model must be a multiple of 128 (lane-aligned head packing)"
    B, Lq = q_arr.shape[0], q_arr.shape[1]
    Lk = kv_arr.shape[1]
    tq = _choose_tile(Lq, tq_target, (16, 8))
    grid = (B, Lq // tq)

    in_specs = [
        pl.BlockSpec((1, tq, d_model), lambda b, qi, c=q_col: (b, qi, c)),
        pl.BlockSpec((1, Lk, d_model), lambda b, qi, c=k_col: (b, 0, c)),
        pl.BlockSpec((1, Lk, d_model), lambda b, qi, c=v_col: (b, 0, c)),
        pl.BlockSpec((1, 1, Lk), lambda b, qi: (b, 0, 0)),
    ]
    out_shape = [jax.ShapeDtypeStruct((B, Lq, d_model), jnp.bfloat16)]
    out_specs = [pl.BlockSpec((1, tq, d_model), lambda b, qi: (b, qi, 0))]
    if return_attn:
        out_shape.append(jax.ShapeDtypeStruct((B, n_head, Lq, Lk), jnp.float32))
        out_specs.append(pl.BlockSpec((1, n_head, tq, Lk), lambda b, qi: (b, 0, qi, 0)))

    res = pl.pallas_call(
        functools.partial(mha_kernel, n_head=n_head, causal=causal, block_q=tq),
        grid=grid,
        in_specs=in_specs,
        out_specs=out_specs,
        out_shape=out_shape,
        compiler_params=pltpu.CompilerParams(
            dimension_semantics=("parallel", "parallel"),   # B x Lq-tiles -> feeds 2 TCs on v7x
            vmem_limit_bytes=VMEM_LIMIT),
    )(q_arr, kv_arr, kv_arr, add_mask)
    return (res[0], res[1]) if return_attn else (res[0], None)


# ----------------------------------------------------------------------------- #
# Model components (plain-JAX glue around the Pallas kernels)
# ----------------------------------------------------------------------------- #
def self_attention_block(x, pad_mask, p, n_head, causal):
    B, L, D = x.shape
    qkv = pallas_linear(x.reshape(B * L, D), p["wqkv"], p["bqkv"]).reshape(B, L, 3 * D)
    o, _ = pallas_mha(qkv, qkv, 0, 1, 2, pad_mask, n_head, D, causal=causal)
    o = pallas_linear(o.reshape(B * L, D), p["wo"], p["bo"]).reshape(B, L, D)
    return o


def cross_attention_block(x_q, x_kv, pad_mask, p, n_head, return_attn=False):
    B, Lq, D = x_q.shape
    Lk = x_kv.shape[1]
    q = pallas_linear(x_q.reshape(B * Lq, D), p["wq"], p["bq"]).reshape(B, Lq, D)
    kv = pallas_linear(x_kv.reshape(B * Lk, D), p["wkv"], p["bkv"]).reshape(B, Lk, 2 * D)
    o, attn = pallas_mha(q, kv, 0, 0, 1, pad_mask, n_head, D,
                         causal=False, return_attn=return_attn)
    o = pallas_linear(o.reshape(B * Lq, D), p["wo"], p["bo"]).reshape(B, Lq, D)
    return o, attn


def feed_forward(x, p):
    B, L, D = x.shape
    y = pallas_ffn(x.reshape(B * L, D), p["w1"], p["b1"], p["w2"], p["b2"])
    return y.reshape(B, L, D)


def add_layer_norm(x, y, p):
    B, L, D = x.shape
    return pallas_add_layernorm(
        x.reshape(B * L, D), y.reshape(B * L, D), p["g"], p["b"]
    ).reshape(B, L, D)


def sinusoidal_pe(max_len, d):
    pos = jnp.arange(max_len, dtype=jnp.float32)[:, None]
    i = jnp.arange(d, dtype=jnp.float32)[None, :]
    angle = pos / jnp.power(10000.0, (2.0 * jnp.floor(i / 2.0)) / d)
    return jnp.where((jnp.arange(d) % 2) == 0, jnp.sin(angle), jnp.cos(angle))


def _pad_additive_mask(tokens, pad_idx):
    # [B, 1, L] additive f32 key-padding mask
    return jnp.where((tokens == pad_idx)[:, None, :], -1e9, 0.0).astype(jnp.float32)


def encoder_forward(source, params, cfg):
    B, Ls = source.shape
    D, H = cfg["hidden_dim"], cfg["n_head"]
    src_mask = _pad_additive_mask(source, cfg["pad_idx"])

    x = jnp.take(params["src_emb"], source, axis=0) * math.sqrt(D) + params["pe"][:Ls][None]
    x = x.astype(jnp.bfloat16)

    for lyr in params["enc_layers"]:
        sa = self_attention_block(x, src_mask, lyr["self_attn"], H, causal=False)
        x = add_layer_norm(x, sa, lyr["ln1"])
        ff = feed_forward(x, lyr["ffn"])
        x = add_layer_norm(x, ff, lyr["ln2"])
    return x


def decoder_forward(target, source, enc_out, params, cfg):
    B, Lt = target.shape
    D, H = cfg["hidden_dim"], cfg["n_head"]

    tgt_mask = _pad_additive_mask(target, cfg["pad_idx"])     # causal term added in-kernel
    cross_mask = _pad_additive_mask(source, cfg["pad_idx"])

    y = jnp.take(params["tgt_emb"], target, axis=0) * math.sqrt(D) + params["pe"][:Lt][None]
    y = y.astype(jnp.bfloat16)

    attn_map = None
    n_layers = len(params["dec_layers"])
    for idx, lyr in enumerate(params["dec_layers"]):
        last = idx == n_layers - 1
        sa = self_attention_block(y, tgt_mask, lyr["self_attn"], H, causal=True)
        y = add_layer_norm(y, sa, lyr["ln1"])
        ca, am = cross_attention_block(y, enc_out, cross_mask, lyr["cross_attn"], H,
                                       return_attn=last)
        if last:
            attn_map = am
        y = add_layer_norm(y, ca, lyr["ln2"])
        ff = feed_forward(y, lyr["ffn"])
        y = add_layer_norm(y, ff, lyr["ln3"])

    logits = pallas_linear(y.reshape(B * Lt, D), params["out_w"], params["out_b"],
                           out_dtype=jnp.float32).reshape(B, Lt, -1)
    return logits, attn_map


def transformer_forward(source, target, params, cfg):
    enc_out = encoder_forward(source, params, cfg)
    output, attn_map = decoder_forward(target, source, enc_out, params, cfg)
    return output, attn_map


# ----------------------------------------------------------------------------- #
# Deterministic parameter initialization
# ----------------------------------------------------------------------------- #
def init_params(key, cfg):
    D, F, H = cfg["hidden_dim"], cfg["ff_dim"], cfg["n_head"]
    V_in, V_out = cfg["input_dim"], cfg["output_dim"]
    Dh = D // H
    scale = 1.0 / math.sqrt(Dh)

    def nrm(k, shape, std=0.02):
        return (std * jax.random.normal(k, shape)).astype(jnp.float32)

    keys = iter(jax.random.split(key, 256))

    def self_attn_params():
        # fold 1/sqrt(Dh) into the Q projection weights (valid: Q bias is zero)
        wq = nrm(next(keys), (D, D)) * scale
        wk = nrm(next(keys), (D, D))
        wv = nrm(next(keys), (D, D))
        return dict(
            wqkv=jnp.concatenate([wq, wk, wv], axis=1).astype(jnp.bfloat16),
            bqkv=jnp.zeros((1, 3 * D), jnp.float32),
            wo=nrm(next(keys), (D, D)).astype(jnp.bfloat16),
            bo=jnp.zeros((1, D), jnp.float32),
        )

    def cross_attn_params():
        wq = nrm(next(keys), (D, D)) * scale
        wk = nrm(next(keys), (D, D))
        wv = nrm(next(keys), (D, D))
        return dict(
            wq=wq.astype(jnp.bfloat16), bq=jnp.zeros((1, D), jnp.float32),
            wkv=jnp.concatenate([wk, wv], axis=1).astype(jnp.bfloat16),
            bkv=jnp.zeros((1, 2 * D), jnp.float32),
            wo=nrm(next(keys), (D, D)).astype(jnp.bfloat16),
            bo=jnp.zeros((1, D), jnp.float32),
        )

    def ffn_params():
        return dict(
            w1=nrm(next(keys), (D, F)).astype(jnp.bfloat16),
            b1=jnp.zeros((1, F), jnp.float32),
            w2=nrm(next(keys), (F, D)).astype(jnp.bfloat16),
            b2=jnp.zeros((1, D), jnp.float32),
        )

    def ln_params():
        return dict(g=jnp.ones((1, D), jnp.float32), b=jnp.zeros((1, D), jnp.float32))

    src_emb = nrm(next(keys), (V_in, D)).at[cfg["pad_idx"]].set(0.0)   # padding_idx -> zero row
    tgt_emb = nrm(next(keys), (V_out, D)).at[cfg["pad_idx"]].set(0.0)

    enc_layers = [
        dict(self_attn=self_attn_params(), ln1=ln_params(),
             ffn=ffn_params(), ln2=ln_params())
        for _ in range(cfg["n_layer"])
    ]
    dec_layers = [
        dict(
            self_attn=self_attn_params(), ln1=ln_params(),
            cross_attn=cross_attn_params(), ln2=ln_params(),
            ffn=ffn_params(), ln3=ln_params(),
        )
        for _ in range(cfg["n_layer"])
    ]
    return dict(
        src_emb=src_emb,
        tgt_emb=tgt_emb,
        pe=sinusoidal_pe(cfg["max_len"], D).astype(jnp.float32),
        enc_layers=enc_layers,
        dec_layers=dec_layers,
        out_w=nrm(next(keys), (D, V_out)).astype(jnp.bfloat16),
        out_b=jnp.zeros((1, V_out), jnp.float32),
    )


# ----------------------------------------------------------------------------- #
if __name__ == "__main__":
    cfg = dict(
        input_dim=64,
        output_dim=64,
        hidden_dim=128,     # multiple of 128 -> lane-aligned head-packed attention blocks
        ff_dim=256,
        n_head=4,
        n_layer=2,
        max_len=16,
        pad_idx=0,
    )
    B, Ls, Lt = 2, 8, 8

    key = jax.random.PRNGKey(0)
    k_p, k_s, k_t = jax.random.split(key, 3)
    params = init_params(k_p, cfg)

    source = jax.random.randint(k_s, (B, Ls), 1, cfg["input_dim"], dtype=jnp.int32)
    target = jax.random.randint(k_t, (B, Lt), 1, cfg["output_dim"], dtype=jnp.int32)
    # a couple of trailing pad tokens to exercise the padding masks
    source = source.at[:, -2:].set(cfg["pad_idx"])
    target = target.at[:, -1:].set(cfg["pad_idx"])

    output, attn_map = transformer_forward(source, target, params, cfg)
    jax.block_until_ready((output, attn_map))

    assert output.shape == (B, Lt, cfg["output_dim"])
    assert attn_map.shape == (B, cfg["n_head"], Lt, Ls)
    assert bool(jnp.all(jnp.isfinite(output))) and bool(jnp.all(jnp.isfinite(attn_map)))
    print("KERNEL_OK")
</pallas_src>

<mosaic_0001>
module attributes {stable_mosaic.version = 11 : i64} {
  func.func @matmul_bias_kernel(%arg0: i32, %arg1: i32, %arg2: i32, %arg3: memref<16x128xbf16, #tpu.memory_space<vmem>>, %arg4: memref<128x384xbf16, #tpu.memory_space<vmem>>, %arg5: memref<1x384xf32, #tpu.memory_space<vmem>>, %arg6: memref<16x384xbf16, #tpu.memory_space<vmem>>, %arg7: memref<16x384xf32, #tpu.memory_space<vmem>>) attributes {dimension_semantics = [#tpu.dimension_semantics<parallel>, #tpu.dimension_semantics<parallel>, #tpu.dimension_semantics<arbitrary>], iteration_bounds = array<i64: 1, 1, 1>, scalar_prefetch = 0 : i64, scratch_operands = 1 : i64, tpu.core_type = #tpu.core_type<tc>, window_params = [{transform_indices = @transform_0, window_bounds = array<i64: 16, 128>}, {transform_indices = @transform_1, window_bounds = array<i64: 128, 384>}, {transform_indices = @transform_2, window_bounds = array<i64: 1, 384>}, {transform_indices = @transform_3, window_bounds = array<i64: 16, 384>}]} {
    %c0_i32 = arith.constant 0 : i32
    %0 = arith.cmpi eq, %arg2, %c0_i32 : i32
    %1 = arith.extui %0 : i1 to i32
    %c0_i32_0 = arith.constant 0 : i32
    %2 = arith.cmpi ne, %1, %c0_i32_0 : i32
    scf.if %2 {
      %cst_10 = arith.constant 0.000000e+00 : f32
      %12 = vector.broadcast %cst_10 : f32 to vector<16x384xf32>
      %c0_11 = arith.constant 0 : index
      %c0_12 = arith.constant 0 : index
      %13 = vector.load %arg7[%c0_11, %c0_12] : memref<16x384xf32, #tpu.memory_space<vmem>>, vector<16x384xf32>
      tpu.vector_store %arg7[%c0_11, %c0_12], %12 {strides = array<i32>} : memref<16x384xf32, #tpu.memory_space<vmem>>, vector<16x384xf32>,
    } else {
    }
    %c0 = arith.constant 0 : index
    %c0_1 = arith.constant 0 : index
    %3 = vector.load %arg7[%c0, %c0_1] : memref<16x384xf32, #tpu.memory_space<vmem>>, vector<16x384xf32>
    %c0_2 = arith.constant 0 : index
    %c0_3 = arith.constant 0 : index
    %4 = vector.load %arg3[%c0_2, %c0_3] : memref<16x128xbf16, #tpu.memory_space<vmem>>, vector<16x128xbf16>
    %c0_4 = arith.constant 0 : index
    %c0_5 = arith.constant 0 : index
    %5 = vector.load %arg4[%c0_4, %c0_5] : memref<128x384xbf16, #tpu.memory_space<vmem>>, vector<128x384xbf16>
    %cst = arith.constant dense<0.000000e+00> : vector<16x384xf32>
    %6 = tpu.matmul %4, %5, %cst {dimension_numbers = #tpu.dot_dimension_numbers<[1], [0], [0], [1], [0, 0, 1, 1], [], []>} : vector<16x128xbf16>, vector<128x384xbf16>, vector<16x384xf32> -> vector<16x384xf32>
    %7 = arith.addf %3, %6 : vector<16x384xf32>
    %c0_6 = arith.constant 0 : index
    %c0_7 = arith.constant 0 : index
    %8 = vector.load %arg7[%c0_6, %c0_7] : memref<16x384xf32, #tpu.memory_space<vmem>>, vector<16x384xf32>
    tpu.vector_store %arg7[%c0_6, %c0_7], %7 {strides = array<i32>} : memref<16x384xf32, #tpu.memory_space<vmem>>, vector<16x384xf32>,
    %c0_i32_8 = arith.constant 0 : i32
    %9 = arith.cmpi eq, %arg2, %c0_i32_8 : i32
    %10 = arith.extui %9 : i1 to i32
    %c0_i32_9 = arith.constant 0 : i32
    %11 = arith.cmpi ne, %10, %c0_i32_9 : i32
    scf.if %11 {
      %c0_10 = arith.constant 0 : index
      %c0_11 = arith.constant 0 : index
      %12 = vector.load %arg7[%c0_10, %c0_11] : memref<16x384xf32, #tpu.memory_space<vmem>>, vector<16x384xf32>
      %c0_12 = arith.constant 0 : index
      %c0_13 = arith.constant 0 : index
      %13 = vector.load %arg5[%c0_12, %c0_13] : memref<1x384xf32, #tpu.memory_space<vmem>>, vector<1x384xf32>
      %14 = vector.broadcast %13 : vector<1x384xf32> to vector<16x384xf32>
      %15 = arith.addf %12, %14 : vector<16x384xf32>
      %16 = arith.truncf %15 : vector<16x384xf32> to vector<16x384xbf16>
      %c0_14 = arith.constant 0 : index
      %c0_15 = arith.constant 0 : index
      %17 = vector.load %arg6[%c0_14, %c0_15] : memref<16x384xbf16, #tpu.memory_space<vmem>>, vector<16x384xbf16>
      tpu.vector_store %arg6[%c0_14, %c0_15], %16 {strides = array<i32>} : memref<16x384xbf16, #tpu.memory_space<vmem>>, vector<16x384xbf16>,
    } else {
    }
    return
  }
  func.func @transform_0(%arg0: i32, %arg1: i32, %arg2: i32) -> (i32, i32) {
    %c0_i32 = arith.constant 0 : i32
    return %arg0, %arg2 : i32, i32
  }
  func.func @transform_1(%arg0: i32, %arg1: i32, %arg2: i32) -> (i32, i32) {
    %c0_i32 = arith.constant 0 : i32
    return %arg2, %arg1 : i32, i32
  }
  func.func @transform_2(%arg0: i32, %arg1: i32, %arg2: i32) -> (i32, i32) {
    %c0_i32 = arith.constant 0 : i32
    %c0_i32_0 = arith.constant 0 : i32
    return %c0_i32, %arg1 : i32, i32
  }
  func.func @transform_3(%arg0: i32, %arg1: i32, %arg2: i32) -> (i32, i32) {
    %c0_i32 = arith.constant 0 : i32
    return %arg0, %arg1 : i32, i32
  }
}

</mosaic_0001>

<bundles_post_ra>
// kernel: tpu_custom_call.1
= control target key start
LH: loop header
LB: loop body
LE: loop exit
PB: predicated region body
PF: predicated region fallthrough
CT: control target
= control target key end

     0   :  { %8 = vsyncpa [#allocation4], 0  ;;  %s694_s0 = inlined_call_operand.hbm [shape: bf16[16,128], index: 0, kind: input, shape index: {}]   ;;  %s695_s1 = inlined_call_operand.hbm [shape: bf16[128,384], index: 1, kind: input, shape index: {}]   ;;  %s696_s2 = inlined_call_operand.hbm [shape: f32[1,384], index: 2, kind: input, shape index: {}]   ;;  %s697_s3 = inlined_call_operand.hbm [shape: bf16[16,384], index: 3, kind: output, shape index: {}]  }
   0x1   :  { %9 = vsyncpa [#allocation7], 0 }
   0x2   :  { %10 = vsyncpa [#allocation5], 0  ;;  %s609_s12 = smov [#allocation6]   ;;  %s515_s16 = scalar_lea.hbm %s695_s1, 3072 }
   0x3   :  { %s28_s13 = sshll.u32 %s609_s12, 4  ;;  %p516_p0 = scmp.ne.s32.totalorder %s695_s1, %s515_s16  ;;  %s29_s13 = int_to_ptr.vmem [resolvable:$true] %s28_s13 }
   0x4   :  { %p519_p1 = scmp.lt.u32.totalorder %s515_s16, %s695_s1 }
   0x6   :  { %p521_p2 = pnand %p519_p1, %p516_p0 }
   0x8   :  { %524 = shalt.err (!%p521_p2)
}
   0x9   :  { %s525_s21 = scalar_lea.vmem %s29_s13, 3072  ;;  %p530_p4 = scmp.lt.s32.totalorder %s29_s13, %s29_s13 }
   0xa   :  { %p526_p3 = scmp.ne.s32.totalorder %s29_s13, %s525_s21  ;;  %p531_p5 = scmp.lt.s32.totalorder %s525_s21, %s525_s21 }
   0xc   :  { %p532_p6 = por %p531_p5, %p530_p4 }
   0xe   :  { %p533_p7 = pnand %p532_p6, %p526_p3 }
  0x10   :  { %536 = shalt.err (!%p533_p7)
}
  0x11   :  { %s610_s22 = smov 192   ;;  %s611_s23 = smov 12  }
  0x12   :  { %34 = dma.hbm_to_vmem [thread:$0]  %s695_s1, 3072, %s29_s13, [#allocation7], %s610_s22, %s610_s22, %s611_s23  }
  0x13   :  { %s612_s26 = smov [#allocation3]   ;;  %s537_s30 = scalar_lea.hbm %s694_s0, 128 }
  0x14   :  { %s16_s27 = sshll.u32 %s612_s26, 4  ;;  %p538_p8 = scmp.ne.s32.totalorder %s694_s0, %s537_s30  ;;  %s17_s27 = int_to_ptr.vmem [resolvable:$true] %s16_s27 }
  0x15   :  { %p541_p9 = scmp.lt.u32.totalorder %s537_s30, %s694_s0 }
  0x17   :  { %p543_p10 = pnand %p541_p9, %p538_p8 }
  0x19   :  { %546 = shalt.err (!%p543_p10)
}
  0x1a   :  { %s547_s8 = scalar_lea.vmem %s17_s27, 128  ;;  %p552_p12 = scmp.lt.s32.totalorder %s17_s27, %s17_s27 }
  0x1b   :  { %p548_p11 = scmp.ne.s32.totalorder %s17_s27, %s547_s8  ;;  %p553_p13 = scmp.lt.s32.totalorder %s547_s8, %s547_s8 }
  0x1d   :  { %p554_p0 = por %p553_p13, %p552_p12 }
  0x1f   :  { %p555_p1 = pnand %p554_p0, %p548_p11 }
  0x21   :  { %558 = shalt.err (!%p555_p1)
}
  0x22   :  { %s613_s1 = smov 64   ;;  %s614_s9 = smov 4  }
  0x23   :  { %22 = dma.hbm_to_vmem [thread:$0]  %s694_s0, 128, %s17_s27, [#allocation4], %s613_s1, %s613_s1, %s614_s9  }
  0x24   :  { %s615_s12 = smov [#allocation8]   ;;  %s559_s16 = scalar_lea.hbm %s696_s2, 48 }
  0x25   :  { %s41_s13 = sshll.u32 %s615_s12, 4  ;;  %p560_p2 = scmp.ne.s32.totalorder %s696_s2, %s559_s16  ;;  %s42_s13 = int_to_ptr.vmem [resolvable:$true] %s41_s13 }
  0x26   :  { %p563_p3 = scmp.lt.u32.totalorder %s559_s16, %s696_s2 }
  0x28   :  { %p565_p4 = pnand %p563_p3, %p560_p2 }
  0x2a   :  { %568 = shalt.err (!%p565_p4)
}
  0x2b   :  { %s569_s21 = scalar_lea.vmem %s42_s13, 48  ;;  %s573_s0 = scalar_lea.vmem %s42_s13, 64 }
  0x2c   :  { %p570_p5 = scmp.ne.s32.totalorder %s42_s13, %s569_s21  ;;  %p574_p6 = scmp.lt.s32.totalorder %s42_s13, %s42_s13 }
  0x2d   :  { %p575_p7 = scmp.lt.s32.totalorder %s573_s0, %s569_s21 }
  0x2f   :  { %p576_p8 = por %p575_p7, %p574_p6 }
  0x31   :  { %p577_p9 = pnand %p576_p8, %p570_p5 }
  0x33   :  { %580 = shalt.err (!%p577_p9)
}
  0x34   :  { %44 = dma.hbm_to_vmem [thread:$0]  %s696_s2, 48, %s42_s13, [#allocation7]  }
  0x35   :  { %603 = dma.done.wait [#allocation4], 128  }
  0x36   :  { %604 = vsyncadd [#allocation4], 4294967168 }
  0x37   :  { %605 = dma.done.wait [#allocation7], 3120  }
  0x38   :  { %606 = vsyncadd [#allocation7], 4294964176  ;;  %v616_v0 = vmov 0.0   ;;  %vm617_vm0 = vmmov 0   ;;  %v618_v1 = vmov 0   ;;  %v514_v26 = vld [vmem:[#allocation3] sm:$0xff]   ;;  %v346_v27 = vlaneseq }
  0x39   :  { %451 = vmatprep.subr.bf16.mxu1 %v616_v0  ;;  %467 = vmatprep.mubr.msk.bf16.mxu1 %vm617_vm0, %v616_v0  ;;  %v482_v2 = vld [vmem:[#allocation6 + $0x4] ss:$12 sps:$4 sm:$0xff]   ;;  %v484_v3 = vld [vmem:[#allocation6 + $0x8] ss:$12 sps:$4 sm:$0xff]   ;;  %v485_v4 = vld [vmem:[#allocation6] ss:$12 sps:$4 sm:$0xff]  }
  0x3a   :  { %271 = vmatprep.mubr.bf16.mxu0 %v618_v1  ;;  %239 = vmatprep.subr.bf16.mxu0 %v482_v2  ;;  %v486_v5 = vld [vmem:[#allocation6 + $0x1c] ss:$12 sps:$4 sm:$0xff]   ;;  %v488_v6 = vld [vmem:[#allocation6 + $0x20] ss:$12 sps:$4 sm:$0xff]   ;;  %v489_v7 = vld [vmem:[#allocation6 + $0x18] ss:$12 sps:$4 sm:$0xff]  }
  0x3b   :  { %452 = vmatpush3.bf16.msra.mxu1 %v484_v3  ;;  %240 = vmatpush1.bf16.msra.mxu0 %v485_v4  ;;  %v490_v8 = vld [vmem:[#allocation6 + $0x34] ss:$12 sps:$4 sm:$0xff]   ;;  %v492_v9 = vld [vmem:[#allocation6 + $0x38] ss:$12 sps:$4 sm:$0xff]   ;;  %v493_v10 = vld [vmem:[#allocation6 + $0x30] ss:$12 sps:$4 sm:$0xff]  }
  0x3c   :  { %453 = vmatprep.subr.bf16.mxu1 %v616_v0  ;;  %241 = vmatprep.subr.bf16.mxu0 %v486_v5  ;;  %v494_v11 = vld [vmem:[#allocation6 + $0x4c] ss:$12 sps:$4 sm:$0xff]   ;;  %v496_v12 = vld [vmem:[#allocation6 + $0x50] ss:$12 sps:$4 sm:$0xff]   ;;  %v497_v13 = vld [vmem:[#allocation6 + $0x48] ss:$12 sps:$4 sm:$0xff]  }
  0x3d   :  { %v498_v14 = vld [vmem:[#allocation6 + $0x64] ss:$12 sps:$4 sm:$0xff]   ;;  %v500_v15 = vld [vmem:[#allocation6 + $0x68] ss:$12 sps:$4 sm:$0xff]   ;;  %v501_v16 = vld [vmem:[#allocation6 + $0x60] ss:$12 sps:$4 sm:$0xff]  }
  0x3e   :  { %v502_v17 = vld [vmem:[#allocation6 + $0x7c] ss:$12 sps:$4 sm:$0xff]   ;;  %v504_v18 = vld [vmem:[#allocation6 + $0x80] ss:$12 sps:$4 sm:$0xff]   ;;  %v505_v19 = vld [vmem:[#allocation6 + $0x78] ss:$12 sps:$4 sm:$0xff]  }
  0x3f   :  { %454 = vmatpush3.bf16.msra.mxu1 %v488_v6  ;;  %242 = vmatpush1.bf16.msra.mxu0 %v489_v7  ;;  %v506_v20 = vld [vmem:[#allocation6 + $0x94] ss:$12 sps:$4 sm:$0xff]   ;;  %v508_v21 = vld [vmem:[#allocation6 + $0x98] ss:$12 sps:$4 sm:$0xff]   ;;  %v509_v22 = vld [vmem:[#allocation6 + $0x90] ss:$12 sps:$4 sm:$0xff]  }
  0x40   :  { %455 = vmatprep.subr.bf16.mxu1 %v616_v0  ;;  %243 = vmatprep.subr.bf16.mxu0 %v490_v8  ;;  %v510_v23 = vld [vmem:[#allocation6 + $0xac] ss:$12 sps:$4 sm:$0xff]   ;;  %v512_v24 = vld [vmem:[#allocation6 + $0xb0] ss:$12 sps:$4 sm:$0xff]   ;;  %v513_v25 = vld [vmem:[#allocation6 + $0xa8] ss:$12 sps:$4 sm:$0xff]  }
  0x41   :  { %v347_v28 = vshrl.u32 %v346_v27, 7  ;;  %v344_v30 = vld [vmem:[#allocation8] sm:$0x7]  ;;  %s619_s2 = smov [#allocation9]  }
  0x42   :  { %s396_s26 = sshll.u32 %s619_s2, 4  ;;  %s397_s26 = int_to_ptr.vmem [resolvable:$true] %s396_s26 }
  0x43   :  { %456 = vmatpush3.bf16.msra.mxu1 %v492_v9  ;;  %244 = vmatpush1.bf16.msra.mxu0 %v493_v10  ;;  %v356_v29 = vsub.s32 2, %v347_v28  ;;  %v348_v31 = vsub.s32 0, %v347_v28  ;;  %v352_v32 = vsub.s32 1, %v347_v28  ;;  %s581_s27 = scalar_lea.vmem %s397_s26, 384  ;;  %p586_p11 = scmp.lt.s32.totalorder %s397_s26, %s397_s26 }
  0x44   :  { %457 = vmatprep.subr.bf16.mxu1 %v616_v0  ;;  %245 = vmatprep.subr.bf16.mxu0 %v494_v11  ;;  %p582_p10 = scmp.ne.s32.totalorder %s397_s26, %s581_s27  ;;  %p587_p12 = scmp.lt.s32.totalorder %s581_s27, %s581_s27 }
  0x45   :  { %v357_v33 = vrot.slane %v344_v30, %v356_v29  ;;  %v349_v34 = vrot.slane %v344_v30, %v348_v31  ;;  %v353_v35 = vrot.slane %v344_v30, %v352_v32 }
  0x46   :  { %p588_p13 = por %p587_p12, %p586_p11 }
  0x47   :  { %458 = vmatpush3.bf16.msra.mxu1 %v496_v12  ;;  %246 = vmatpush1.bf16.msra.mxu0 %v497_v13 }
  0x48   :  { %459 = vmatprep.subr.bf16.mxu1 %v616_v0  ;;  %247 = vmatprep.subr.bf16.mxu0 %v498_v14  ;;  %p589_p0 = pnand %p588_p13, %p582_p10 }
  0x4b   :  { %460 = vmatpush3.bf16.msra.mxu1 %v500_v15  ;;  %248 = vmatpush1.bf16.msra.mxu0 %v501_v16 }
  0x4c   :  { %461 = vmatprep.subr.bf16.mxu1 %v616_v0  ;;  %249 = vmatprep.subr.bf16.mxu0 %v502_v17 }
  0x4f   :  { %462 = vmatpush3.bf16.msra.mxu1 %v504_v18  ;;  %250 = vmatpush1.bf16.msra.mxu0 %v505_v19 }
  0x50   :  { %463 = vmatprep.subr.bf16.mxu1 %v616_v0  ;;  %251 = vmatprep.subr.bf16.mxu0 %v506_v20 }
  0x53   :  { %464 = vmatpush3.bf16.msra.mxu1 %v508_v21  ;;  %252 = vmatpush1.bf16.msra.mxu0 %v509_v22 }
  0x54   :  { %465 = vmatprep.subr.bf16.mxu1 %v616_v0  ;;  %253 = vmatprep.subr.bf16.mxu0 %v510_v23 }
  0x57   :  { %466 = vmatpush3.bf16.msra.mxu1 %v512_v24  ;;  %254 = vmatpush1.bf16.msra.mxu0 %v513_v25 }
  0x5a   :  { %468 = vmatmul.mubr.bf16.vlgmr.msra.gmra.mrb[0].mxu1 %v514_v26  ;;  %272 = vmatmul.mubr.bf16.vlgmr.msra.gmra.mrb[0].mxu0 %v514_v26 }
 0x12d   :  { %v316_v36 = vpop.f32.mrb[0].mxu1  ;;  %v273_v38 = vpop.f32.mrb[0].mxu0 }
 0x12e   :  { %v363_v37 = vadd.f32 %v357_v33, %v316_v36  ;;  %v469_v39 = vpop.f32.mrb[1].mxu1  ;;  %v361_v40 = vadd.f32 %v349_v34, %v273_v38  ;;  %v275_v41 = vpop.f32.mrb[1].mxu0 }
 0x12f   :  { %v319_v42 = vpop.f32.mrb[2].mxu1  ;;  %v362_v44 = vadd.f32 %v353_v35, %v275_v41  ;;  %v277_v46 = vpop.f32.mrb[2].mxu0 }
 0x130   :  { %v439_v43 = vpack.c.bf16 %v363_v37, %v363_v37  ;;  %v366_v45 = vadd.f32 %v357_v33, %v319_v42  ;;  %v470_v47 = vpop.f32.mrb[3].mxu1  ;;  %v364_v48 = vadd.f32 %v349_v34, %v277_v46  ;;  %v279_v49 = vpop.f32.mrb[3].mxu0 }
 0x131   :  { %v438_v50 = vpack.c.bf16 %v362_v44, %v361_v40  ;;  %v365_v52 = vadd.f32 %v353_v35, %v279_v49 }
 0x132   :  { %388 = vst [vmem:[#allocation9 + $0x8] sm:$0xf] %v439_v43  ;;  %v441_v51 = vpack.c.bf16 %v366_v45, %v366_v45 }
 0x133   :  { %387 = vst [vmem:[#allocation9] sm:$0xff] %v438_v50  ;;  %v440_v53 = vpack.c.bf16 %v365_v52, %v364_v48 }
 0x134   :  { %390 = vst [vmem:[#allocation9 + $0x14] sm:$0xf] %v441_v51 }
 0x135   :  { %389 = vst [vmem:[#allocation9 + $0xc] sm:$0xff] %v440_v53 }
 0x136   :  { %592 = shalt.err (!%p589_p0)
}
 0x137   :  { %s593_s30 = scalar_lea.hbm %s697_s3, 384 }
 0x138   :  { %p594_p1 = scmp.ne.s32.totalorder %s697_s3, %s593_s30  ;;  %p597_p2 = scmp.lt.u32.totalorder %s593_s30, %s697_s3 }
 0x13a   :  { %p599_p3 = pnand %p597_p2, %p594_p1 }
 0x13c   :  { %602 = shalt.err (!%p599_p3)
}
 0x13d   :  { %402 = dma.vmem_to_hbm [thread:$0]  %s397_s26, 384, %s697_s3, [#allocation5], %s610_s22, %s610_s22, %s611_s23  }
 0x13e   :  { %607 = dma.done.wait [#allocation5], 384  }
 0x13f   :  { %608 = vsyncadd [#allocation5], 4294966912 }
 0x140   :  { %406 = vsyncpa [#allocation4], 1 }
 0x141   :  { %407 = vsyncpa [#allocation7], 1 }
 0x142   :  { %408 = vsyncpa [#allocation5], 1 }

</bundles_post_ra>
